<compile_context>
chip_gen: v5e
topology: v5e:2x2
jax: 0.10.0
libtpu: 0.0.40
codegen_flags: <defaults>
</compile_context>

<pallas_src>
import math

import jax
import jax.numpy as jnp
from jax import lax
from jax.experimental import pallas as pl
from jax.experimental.pallas import tpu as pltpu

_LANE = 128


def _round_up(v, m):
    return -(-v // m) * m


def _conv1x1_kernel(x_ref, w_ref, b_ref, o_ref):
    # x_ref : (BN, C_in, TL)   batch-block of input positions
    # w_ref : (C_out, C_in)    1x1 conv weight, resident across the grid
    # b_ref : (C_out, 1)       bias column, resident across the grid
    # o_ref : (BN, C_out, TL)
    w = w_ref[...]
    c_out, tl = o_ref.shape[1], o_ref.shape[2]
    # Hoist the lane broadcast of the bias out of the batch loop
    # (JAX does not CSE broadcast_in_dim).
    bias = jnp.broadcast_to(b_ref[...].astype(jnp.float32), (c_out, tl))

    def body(i, carry):
        y = jnp.dot(w, x_ref[i], preferred_element_type=jnp.float32)  # MXU
        o_ref[i] = (y + bias).astype(o_ref.dtype)
        return carry

    lax.fori_loop(0, o_ref.shape[0], body, 0, unroll=True)


def feature_map_block(x, weight, bias, *, block_len=None, block_batch=None,
                      vmem_budget_bytes=8 * 1024 * 1024):
    """Forward pass of FeatureMapBlock (Conv1d, kernel_size=1).

    x      : (N, C_in, L)      float32, PyTorch NCL layout
    weight : (C_out, C_in, 1)  PyTorch Conv1d weight layout
    bias   : (C_out,)
    returns: (N, C_out, L)
    """
    n, c_in, length = x.shape
    c_out = weight.shape[0]
    itemsize = jnp.dtype(x.dtype).itemsize

    w2d = weight.reshape(c_out, c_in).astype(x.dtype)   # drop kernel dim (=1)
    b2d = bias.reshape(c_out, 1)

    # ---- tile selection: lane-dense L tile, VMEM-budget-safe on all gens ----
    if block_len is None:
        tl = min(_round_up(length, _LANE), 1024)
        # shrink if even a single-batch double-buffered (in+out) block busts budget
        max_tl = max(_LANE,
                     (vmem_budget_bytes // (2 * (c_in + c_out) * itemsize))
                     // _LANE * _LANE)
        tl = min(tl, max_tl)
    else:
        tl = block_len
    if block_batch is None:
        per_batch = 2 * (c_in + c_out) * tl * itemsize   # double-buffered in+out
        bn = int(max(1, min(n, 8, vmem_budget_bytes // per_batch)))
    else:
        bn = block_batch

    # ---- pad so blocks tile the arrays exactly (zeros, sliced off below) ----
    n_pad = _round_up(n, bn)
    l_pad = _round_up(length, tl)
    if (n_pad, l_pad) != (n, length):
        x_in = jnp.pad(x, ((0, n_pad - n), (0, 0), (0, l_pad - length)))
    else:
        x_in = x

    grid = (n_pad // bn, l_pad // tl)

    cost = pl.CostEstimate(
        flops=2 * n * c_out * c_in * length,
        transcendentals=0,
        bytes_accessed=itemsize * (n * c_in * length + c_out * c_in + c_out
                                   + n * c_out * length),
    )

    out = pl.pallas_call(
        _conv1x1_kernel,
        out_shape=jax.ShapeDtypeStruct((n_pad, c_out, l_pad), x.dtype),
        grid_spec=pltpu.PrefetchScalarGridSpec(
            num_scalar_prefetch=0,
            grid=grid,
            in_specs=[
                pl.BlockSpec((bn, c_in, tl), lambda i, j: (i, 0, j)),
                pl.BlockSpec((c_out, c_in), lambda i, j: (0, 0)),
                pl.BlockSpec((c_out, 1), lambda i, j: (0, 0)),
            ],
            out_specs=pl.BlockSpec((bn, c_out, tl), lambda i, j: (i, 0, j)),
        ),
        compiler_params=pltpu.CompilerParams(
            dimension_semantics=("parallel", "parallel")),
        cost_estimate=cost,
    )(x_in, w2d, b2d)

    if (n_pad, l_pad) != (n, length):
        out = out[:n, :, :length]
    return out


if __name__ == "__main__":
    # Small shapes consistent with Conv1d: batch=2, C_in=4, C_out=8, L=16.
    N, C_IN, C_OUT, L = 2, 4, 8, 16

    key = jax.random.PRNGKey(0)
    kx, kw, kb = jax.random.split(key, 3)

    x = jax.random.normal(kx, (N, C_IN, L), dtype=jnp.float32)

    # Deterministic init mimicking PyTorch Conv1d default (uniform +/- 1/sqrt(fan_in)).
    bound = 1.0 / math.sqrt(C_IN * 1)
    weight = jax.random.uniform(kw, (C_OUT, C_IN, 1), dtype=jnp.float32,
                                minval=-bound, maxval=bound)
    bias = jax.random.uniform(kb, (C_OUT,), dtype=jnp.float32,
                              minval=-bound, maxval=bound)

    out = feature_map_block(x, weight, bias)
    out = jax.block_until_ready(out)

    # Reference check in plain JAX (same math as nn.Conv1d with kernel_size=1).
    ref = jnp.einsum("oc,ncl->nol", weight[:, :, 0], x) + bias[None, :, None]
    assert out.shape == (N, C_OUT, L)
    assert jnp.allclose(out, ref, atol=1e-5), "mismatch vs reference"

    print("KERNEL_OK")
</pallas_src>

<mosaic_0001>
module attributes {stable_mosaic.version = 11 : i64} {
  func.func @_conv1x1_kernel(%arg0: i32, %arg1: i32, %arg2: memref<2x4x128xf32, #tpu.memory_space<vmem>>, %arg3: memref<8x4xf32, #tpu.memory_space<vmem>>, %arg4: memref<8x1xf32, #tpu.memory_space<vmem>>, %arg5: memref<2x8x128xf32, #tpu.memory_space<vmem>>) attributes {dimension_semantics = [#tpu.dimension_semantics<parallel>, #tpu.dimension_semantics<parallel>], iteration_bounds = array<i64: 1, 1>, scalar_prefetch = 0 : i64, scratch_operands = 0 : i64, tpu.core_type = #tpu.core_type<tc>, window_params = [{transform_indices = @transform_0, window_bounds = array<i64: 2, 4, 128>}, {pipeline_mode = #tpu.pipeline_mode<synchronous>, transform_indices = @transform_1, window_bounds = array<i64: 8, 4>}, {pipeline_mode = #tpu.pipeline_mode<synchronous>, transform_indices = @transform_2, window_bounds = array<i64: 8, 1>}, {transform_indices = @transform_3, window_bounds = array<i64: 2, 8, 128>}]} {
    %c0 = arith.constant 0 : index
    %c0_0 = arith.constant 0 : index
    %0 = vector.load %arg3[%c0, %c0_0] : memref<8x4xf32, #tpu.memory_space<vmem>>, vector<8x4xf32>
    %c0_1 = arith.constant 0 : index
    %c0_2 = arith.constant 0 : index
    %1 = vector.load %arg4[%c0_1, %c0_2] : memref<8x1xf32, #tpu.memory_space<vmem>>, vector<8x1xf32>
    %2 = vector.shape_cast %1 : vector<8x1xf32> to vector<8x1xf32>
    %3 = vector.broadcast %2 : vector<8x1xf32> to vector<8x128xf32>
    %c0_i32 = arith.constant 0 : i32
    %4 = arith.index_cast %c0_i32 : i32 to index
    %c0_3 = arith.constant 0 : index
    %c0_4 = arith.constant 0 : index
    %5 = vector.load %arg2[%4, %c0_3, %c0_4] : memref<2x4x128xf32, #tpu.memory_space<vmem>>, vector<1x4x128xf32>
    %6 = vector.shape_cast %5 : vector<1x4x128xf32> to vector<4x128xf32>
    %cst = arith.constant dense<0.000000e+00> : vector<8x128xf32>
    %7 = tpu.matmul %0, %6, %cst {dimension_numbers = #tpu.dot_dimension_numbers<[1], [0], [0], [1], [0, 0, 1, 1], [], []>} : vector<8x4xf32>, vector<4x128xf32>, vector<8x128xf32> -> vector<8x128xf32>
    %8 = arith.addf %7, %3 : vector<8x128xf32>
    %9 = arith.index_cast %c0_i32 : i32 to index
    %c0_5 = arith.constant 0 : index
    %c0_6 = arith.constant 0 : index
    %10 = vector.load %arg5[%9, %c0_5, %c0_6] : memref<2x8x128xf32, #tpu.memory_space<vmem>>, vector<1x8x128xf32>
    %11 = vector.shape_cast %10 : vector<1x8x128xf32> to vector<8x128xf32>
    %12 = vector.shape_cast %8 : vector<8x128xf32> to vector<1x8x128xf32>
    tpu.vector_store %arg5[%9, %c0_5, %c0_6], %12 {strides = array<i32>} : memref<2x8x128xf32, #tpu.memory_space<vmem>>, vector<1x8x128xf32>,
    %c1_i32 = arith.constant 1 : i32
    %13 = arith.index_cast %c1_i32 : i32 to index
    %c0_7 = arith.constant 0 : index
    %c0_8 = arith.constant 0 : index
    %14 = vector.load %arg2[%13, %c0_7, %c0_8] : memref<2x4x128xf32, #tpu.memory_space<vmem>>, vector<1x4x128xf32>
    %15 = vector.shape_cast %14 : vector<1x4x128xf32> to vector<4x128xf32>
    %cst_9 = arith.constant dense<0.000000e+00> : vector<8x128xf32>
    %16 = tpu.matmul %0, %15, %cst_9 {dimension_numbers = #tpu.dot_dimension_numbers<[1], [0], [0], [1], [0, 0, 1, 1], [], []>} : vector<8x4xf32>, vector<4x128xf32>, vector<8x128xf32> -> vector<8x128xf32>
    %17 = arith.addf %16, %3 : vector<8x128xf32>
    %18 = arith.index_cast %c1_i32 : i32 to index
    %c0_10 = arith.constant 0 : index
    %c0_11 = arith.constant 0 : index
    %19 = vector.load %arg5[%18, %c0_10, %c0_11] : memref<2x8x128xf32, #tpu.memory_space<vmem>>, vector<1x8x128xf32>
    %20 = vector.shape_cast %19 : vector<1x8x128xf32> to vector<8x128xf32>
    %21 = vector.shape_cast %17 : vector<8x128xf32> to vector<1x8x128xf32>
    tpu.vector_store %arg5[%18, %c0_10, %c0_11], %21 {strides = array<i32>} : memref<2x8x128xf32, #tpu.memory_space<vmem>>, vector<1x8x128xf32>,
    %c2_i32 = arith.constant 2 : i32
    return
  }
  func.func @transform_0(%arg0: i32, %arg1: i32) -> (i32, i32, i32) {
    %c0_i32 = arith.constant 0 : i32
    %c0_i32_0 = arith.constant 0 : i32
    return %arg0, %c0_i32, %arg1 : i32, i32, i32
  }
  func.func @transform_1(%arg0: i32, %arg1: i32) -> (i32, i32) {
    %c0_i32 = arith.constant 0 : i32
    %c0_i32_0 = arith.constant 0 : i32
    %c0_i32_1 = arith.constant 0 : i32
    return %c0_i32, %c0_i32_0 : i32, i32
  }
  func.func @transform_2(%arg0: i32, %arg1: i32) -> (i32, i32) {
    %c0_i32 = arith.constant 0 : i32
    %c0_i32_0 = arith.constant 0 : i32
    %c0_i32_1 = arith.constant 0 : i32
    return %c0_i32, %c0_i32_0 : i32, i32
  }
  func.func @transform_3(%arg0: i32, %arg1: i32) -> (i32, i32, i32) {
    %c0_i32 = arith.constant 0 : i32
    %c0_i32_0 = arith.constant 0 : i32
    return %arg0, %c0_i32, %arg1 : i32, i32, i32
  }
}

</mosaic_0001>

<bundles_post_ra>
// kernel: tpu_custom_call.1
= control target key start
LH: loop header
LB: loop body
LE: loop exit
PB: predicated region body
PF: predicated region fallthrough
CT: control target
= control target key end

     0   :  { %vm27_vm0 = vcmask 1043456   ;;  %vm23_vm1 = vcmask 31744   ;;  %s172_s0 = inlined_call_operand.vmem [shape: f32[2,4,128], index: 0, kind: input, shape index: {}]   ;;  %s173_s1 = inlined_call_operand.vmem [shape: f32[8,4], index: 1, kind: input, shape index: {}]   ;;  %s174_s2 = inlined_call_operand.vmem [shape: f32[8,1], index: 2, kind: input, shape index: {}]   ;;  %s175_s3 = inlined_call_operand.hbm [shape: f32[2,8,128], index: 3, kind: output, shape index: {}]  }
   0x1   :  { %v22_v0 = vld [vmem:[%s172_s0] sm:$0xf]  ;;  %v99_v1 = vld [vmem:[%s172_s0 + $0x4] sm:$0xf] }
   0x2   :  { %v15_v2 = vld [vmem:[%s173_s1] sm:$0xff]  ;;  %97 = vmatpush.msk.msra.mxu0 %vm27_vm0, %v22_v0  ;;  %100 = vmatpush.msk.msra.mxu1 %vm27_vm0, %v99_v1 }
   0x3   :  { %v16_v3 = vld [vmem:[%s174_s2] sm:$0xff] }
   0x4   :  { %8 = vsyncpa [#allocation3], 0  ;;  %98 = vmatmul.msk.f32.vlgmr.msra.gmra.mxu0 %vm23_vm1, %v15_v2  ;;  %101 = vmatmul.msk.f32.vlgmr.msra.gmra.mxu1 %vm23_vm1, %v15_v2  ;;  %v133_v4 = vmov 0   ;;  %s134_s20 = smov [#allocation2]   ;;  %s85_s1 = sshll.u32 %s175_s3, 4  ;;  %s86_s1 = int_to_ptr.hbm [resolvable:$true] %s85_s1 }
   0x5   :  { %106 = vset.pattern.permute.xlu0 %v133_v4  ;;  %s83_s0 = sshll.u32 %s134_s20, 4  ;;  %s135_s2 = smov 128   ;;  %s84_s0 = int_to_ptr.vmem [resolvable:$true] %s83_s0 }
   0x6   :  { %19 = vperm.xlu0 %106, %v16_v3   ;;  %s136_s23 = smov 8  }
  0x78   :  { %v20_v5 = vpop.permute.xlu0 %19 }
  0x81   :  { %v48_v6 = vpop.f32.mrf.mxu0  ;;  %v74_v7 = vpop.f32.mrf.mxu1 }
  0x82   :  { %v49_v8 = vadd.f32 %v48_v6, %v20_v5  ;;  %v75_v9 = vadd.f32 %v74_v7, %v20_v5 }
  0x84   :  { %51 = vst [vmem:[#allocation2] sm:$0xff] %v49_v8 }
  0x85   :  { %78 = vst [vmem:[#allocation2 + $0x8] sm:$0xff] %v75_v9 }
  0x86   :  { %91 = dma.vmem_to_hbm [thread:$0]  %s84_s0, 256, %s86_s1, [#allocation3], %s135_s2, %s135_s2, %s136_s23  }
  0x87   :  { %131 = dma.done.wait [#allocation3], 256  }
  0x88   :  { %132 = vsyncadd [#allocation3], 4294967040 }
  0x89   :  { %96 = vsyncpa [#allocation3], 1 }

</bundles_post_ra>
